<compile_context>
chip_gen: v5e
topology: v5e:2x2
jax: 0.10.0
libtpu: 0.0.40
codegen_flags: <defaults>
</compile_context>

<pallas_src>
import functools

import jax
import jax.numpy as jnp
from jax import lax
from jax.experimental import pallas as pl
from jax.experimental.pallas import tpu as pltpu

LN_EPS = 1e-5


def _round_up(n, m):
    return ((n + m - 1) // m) * m


def _vmem_capacity_bytes():
    """Per-core VMEM capacity; conservative (v7x, 64 MiB) fallback if unqueryable."""
    try:
        cap = int(getattr(pltpu.get_tpu_info(), "vmem_capacity_bytes", 0))
        if cap > 0:
            return cap
    except Exception:
        pass
    return 64 * 1024 * 1024


def _choose_row_tile(n_rows, f_pad, x_itemsize, out_itemsize, vmem_limit):
    """Largest row tile (multiple of 8, <= 2048) that fits the VMEM budget."""
    budget = int(vmem_limit * 0.6)                      # headroom for compiler scratch
    const_bytes = f_pad * f_pad * 2 + 4 * f_pad * 4     # single-buffered bf16 W + vectors
    avail = max(budget - const_bytes, 1 << 20)
    # per-row bytes: double-buffered input + double-buffered output + ~3 live f32 temps
    per_row = f_pad * (2 * x_itemsize + 2 * out_itemsize + 3 * 4)
    tile = max(8, min(2048, (avail // per_row) // 8 * 8))
    tile = min(tile, _round_up(n_rows, 8))
    if n_rows >= 16:
        # keep >= 2 grid steps so both v7x TensorCores get work
        tile = min(tile, _round_up(pl.cdiv(n_rows, 2), 8))
    return tile


def _skip_connection_kernel(x_ref, gamma_ref, w_ref, bias_ref, o_ref, *,
                            num_features):
    """One row-tile: LayerNorm (f32 stats) -> Linear (bf16 MXU, f32 acc) -> residual."""
    f_pad = x_ref.shape[-1]
    xf = x_ref[...].astype(jnp.float32)                          # (TN, Fp)

    # LayerNorm over the true feature count (biased variance, torch semantics).
    inv_f = jnp.float32(1.0 / num_features)
    mean = jnp.sum(xf, axis=-1, keepdims=True) * inv_f
    centered = xf - mean
    if num_features != f_pad:
        # zero padded lanes so they don't contaminate the variance sum
        lane = lax.broadcasted_iota(jnp.int32, (1, f_pad), 1)
        centered = centered * (lane < num_features).astype(jnp.float32)
    var = jnp.sum(centered * centered, axis=-1, keepdims=True) * inv_f
    xn = centered * lax.rsqrt(var + LN_EPS) * gamma_ref[...]     # beta folded into bias

    # Linear: xn @ W_t with W_t already laid out (F_in, F_out) -> plain MXU
    # contraction, bf16 operands, f32 accumulation.
    y = jnp.dot(xn.astype(w_ref.dtype), w_ref[...],
                preferred_element_type=jnp.float32)              # (TN, Fp)

    # fused bias (= beta @ W.T + b, f32) + skip connection.  Fresh x_ref read so
    # the earlier f32 upcast doesn't stay live across the MXU phase.
    o_ref[...] = (y + bias_ref[...]
                  + x_ref[...].astype(jnp.float32)).astype(o_ref.dtype)


@functools.partial(jax.jit, static_argnames=("row_tile", "compute_dtype"))
def skip_connection(x, gamma, beta, weight, bias, *, row_tile=None,
                    compute_dtype=jnp.bfloat16):
    """out = LayerNorm(x) @ weight.T + bias + x   (LayerNorm over last dim).

    Args:
      x:      (B, S, F)   (works for f32 or bf16 inputs; out keeps x.dtype)
      gamma:  (F,)   LayerNorm scale
      beta:   (F,)   LayerNorm shift
      weight: (F, F) Linear weight (PyTorch convention: out = x @ weight.T + b)
      bias:   (F,)   Linear bias
      row_tile:      rows of the flattened (B*S, F) view per grid step
                     (None = auto-size from the chip's VMEM capacity).
      compute_dtype: MXU operand dtype for the matmul (accumulation stays f32).
    """
    B, S, F = x.shape
    N = B * S
    F_pad = _round_up(F, 128)          # lane-dense loads/stores

    x2 = x.reshape(N, F)
    if F_pad != F:
        x2 = jnp.pad(x2, ((0, 0), (0, F_pad - F)))

    # Fold beta and the Linear bias:
    #   out = (xn * gamma) @ W.T + (beta @ W.T + bias) + x
    w32 = weight.astype(jnp.float32)
    fused_bias = beta.astype(jnp.float32) @ w32.T + bias.astype(jnp.float32)
    w_t = w32.T.astype(compute_dtype)                  # (F_in, F_out), one-time transpose

    gamma2 = gamma.reshape(1, F).astype(jnp.float32)
    bias2 = fused_bias.reshape(1, F)
    if F_pad != F:
        gamma2 = jnp.pad(gamma2, ((0, 0), (0, F_pad - F)))
        bias2 = jnp.pad(bias2, ((0, 0), (0, F_pad - F)))
        w_t = jnp.pad(w_t, ((0, F_pad - F), (0, F_pad - F)))

    vmem_cap = _vmem_capacity_bytes()
    vmem_limit = min(int(vmem_cap * 0.75), 100 * 1024 * 1024)
    if row_tile is None:
        tile = _choose_row_tile(N, F_pad, x.dtype.itemsize, x.dtype.itemsize,
                                vmem_limit)
    else:
        tile = max(8, min(_round_up(row_tile, 8), _round_up(N, 8)))

    grid = (pl.cdiv(N, tile),)   # no host-side row padding; last block is ragged

    # TODO(synk): for F >= ~3-4k on v7x (64 MiB VMEM), add an inner 'arbitrary'
    # grid axis over F_out (W BlockSpec (F_pad, tn), out BlockSpec (tile, tn))
    # and cache xn in a VMEM scratch across it instead of keeping the whole
    # (F_pad, F_pad) weight resident.
    const = pl.Buffered(1)   # constant-index operands: no second VMEM buffer
    out2 = pl.pallas_call(
        functools.partial(_skip_connection_kernel, num_features=F),
        out_shape=jax.ShapeDtypeStruct((N, F_pad), x.dtype),
        grid_spec=pltpu.PrefetchScalarGridSpec(
            num_scalar_prefetch=0,
            grid=grid,
            in_specs=[
                pl.BlockSpec((tile, F_pad), lambda i: (i, 0)),                        # x rows
                pl.BlockSpec((1, F_pad), lambda i: (0, 0), pipeline_mode=const),      # gamma
                pl.BlockSpec((F_pad, F_pad), lambda i: (0, 0), pipeline_mode=const),  # W.T
                pl.BlockSpec((1, F_pad), lambda i: (0, 0), pipeline_mode=const),      # fused bias
            ],
            out_specs=pl.BlockSpec((tile, F_pad), lambda i: (i, 0)),
        ),
        compiler_params=pltpu.CompilerParams(
            dimension_semantics=("parallel",),
            vmem_limit_bytes=vmem_limit),
    )(x2, gamma2, w_t, bias2)

    if F_pad != F:
        out2 = out2[:, :F]
    return out2.reshape(B, S, F)


def _reference_mirror(x, gamma, beta, weight, bias, compute_dtype=jnp.bfloat16):
    """Pure-JAX mirror of the kernel (f32 LN stats, bf16 matmul, fused f32 bias)."""
    xf = x.astype(jnp.float32)
    mean = jnp.mean(xf, axis=-1, keepdims=True)
    var = jnp.mean((xf - mean) ** 2, axis=-1, keepdims=True)
    xn = (xf - mean) * lax.rsqrt(var + LN_EPS) * gamma
    w32 = weight.astype(jnp.float32)
    fused_bias = beta.astype(jnp.float32) @ w32.T + bias.astype(jnp.float32)
    y = jnp.dot(xn.astype(compute_dtype), w32.T.astype(compute_dtype),
                preferred_element_type=jnp.float32)
    return (y + fused_bias + xf).astype(x.dtype)


def _reference_f32(x, gamma, beta, weight, bias):
    """Full-f32 PyTorch-semantics reference (loose drift check)."""
    xf = x.astype(jnp.float32)
    mean = jnp.mean(xf, axis=-1, keepdims=True)
    var = jnp.mean((xf - mean) ** 2, axis=-1, keepdims=True)
    xn = (xf - mean) / jnp.sqrt(var + LN_EPS)
    xn = xn * gamma + beta
    y = xn @ weight.T.astype(jnp.float32) + bias
    return (y + xf).astype(x.dtype)


def _run_case(key, B, S, F, affine_random):
    kx, kw, kb, kg, kbt = jax.random.split(key, 5)
    x = jax.random.normal(kx, (B, S, F), dtype=jnp.float32)
    weight = jax.random.normal(kw, (F, F), dtype=jnp.float32) * (1.0 / jnp.sqrt(F))
    bias = jax.random.normal(kb, (F,), dtype=jnp.float32) * 0.1
    if affine_random:
        gamma = 1.0 + 0.1 * jax.random.normal(kg, (F,), dtype=jnp.float32)
        beta = 0.1 * jax.random.normal(kbt, (F,), dtype=jnp.float32)
    else:  # nn.LayerNorm default init
        gamma = jnp.ones((F,), dtype=jnp.float32)
        beta = jnp.zeros((F,), dtype=jnp.float32)

    out = jax.block_until_ready(skip_connection(x, gamma, beta, weight, bias))
    assert out.shape == (B, S, F)

    ref = _reference_mirror(x, gamma, beta, weight, bias)
    assert jnp.allclose(out, ref, atol=2e-3, rtol=2e-3), \
        f"mismatch vs mirrored reference (B={B},S={S},F={F})"
    ref32 = _reference_f32(x, gamma, beta, weight, bias)
    assert jnp.allclose(out, ref32, atol=1e-1, rtol=1e-1), \
        f"mismatch vs f32 reference (B={B},S={S},F={F})"


if __name__ == "__main__":
    key = jax.random.PRNGKey(0)
    k1, k2 = jax.random.split(key)

    # Case 1: small shape from the module's docstring style (F=32 -> feature
    # dim padded to 128, masked LayerNorm stats), LayerNorm default affine.
    _run_case(k1, B=2, S=8, F=32, affine_random=False)

    # Case 2: F already a multiple of 128 (no feature padding), ragged row
    # count (N=21 -> 2 grid steps, partial last block), random gamma/beta to
    # exercise the fused-bias folding.
    _run_case(k2, B=3, S=7, F=128, affine_random=True)

    print("KERNEL_OK")
</pallas_src>

<mosaic_0001>
module attributes {stable_mosaic.version = 11 : i64} {
  func.func @_skip_connection_kernel(%arg0: i32, %arg1: memref<8x128xf32, #tpu.memory_space<vmem>>, %arg2: memref<1x128xf32, #tpu.memory_space<vmem>>, %arg3: memref<128x128xbf16, #tpu.memory_space<vmem>>, %arg4: memref<1x128xf32, #tpu.memory_space<vmem>>, %arg5: memref<8x128xf32, #tpu.memory_space<vmem>>) attributes {dimension_semantics = [#tpu.dimension_semantics<parallel>], iteration_bounds = array<i64: 2>, scalar_prefetch = 0 : i64, scratch_operands = 0 : i64, tpu.core_type = #tpu.core_type<tc>, window_params = [{transform_indices = @transform_0, window_bounds = array<i64: 8, 128>}, {pipeline_mode = #tpu.pipeline_mode<synchronous>, transform_indices = @transform_1, window_bounds = array<i64: 1, 128>}, {pipeline_mode = #tpu.pipeline_mode<synchronous>, transform_indices = @transform_2, window_bounds = array<i64: 128, 128>}, {pipeline_mode = #tpu.pipeline_mode<synchronous>, transform_indices = @transform_3, window_bounds = array<i64: 1, 128>}, {transform_indices = @transform_4, window_bounds = array<i64: 8, 128>}]} {
    %c0 = arith.constant 0 : index
    %c0_0 = arith.constant 0 : index
    %0 = vector.load %arg1[%c0, %c0_0] : memref<8x128xf32, #tpu.memory_space<vmem>>, vector<8x128xf32>
    %cst = arith.constant dense<0.000000e+00> : vector<8xf32>
    %1 = vector.multi_reduction <add>, %0, %cst [1] : vector<8x128xf32> to vector<8xf32>
    %2 = vector.shape_cast %1 : vector<8xf32> to vector<8x1xf32>
    %cst_1 = arith.constant 3.125000e-02 : f32
    %3 = vector.broadcast %cst_1 : f32 to vector<8x1xf32>
    %4 = arith.mulf %2, %3 : vector<8x1xf32>
    %5 = vector.broadcast %4 : vector<8x1xf32> to vector<8x128xf32>
    %6 = arith.subf %0, %5 : vector<8x128xf32>
    %7 = tpu.iota {dimensions = array<i32: 1>} : vector<1x128xi32>
    %c32_i32 = arith.constant 32 : i32
    %8 = vector.broadcast %c32_i32 : i32 to vector<1x128xi32>
    %9 = arith.cmpi slt, %7, %8 : vector<1x128xi32>
    %10 = arith.extui %9 : vector<1x128xi1> to vector<1x128xi32>
    %11 = arith.sitofp %10 : vector<1x128xi32> to vector<1x128xf32>
    %12 = vector.broadcast %11 : vector<1x128xf32> to vector<8x128xf32>
    %13 = arith.mulf %6, %12 : vector<8x128xf32>
    %14 = arith.mulf %13, %13 : vector<8x128xf32>
    %cst_2 = arith.constant dense<0.000000e+00> : vector<8xf32>
    %15 = vector.multi_reduction <add>, %14, %cst_2 [1] : vector<8x128xf32> to vector<8xf32>
    %16 = vector.shape_cast %15 : vector<8xf32> to vector<8x1xf32>
    %cst_3 = arith.constant 3.125000e-02 : f32
    %17 = vector.broadcast %cst_3 : f32 to vector<8x1xf32>
    %18 = arith.mulf %16, %17 : vector<8x1xf32>
    %cst_4 = arith.constant 9.99999974E-6 : f32
    %19 = vector.broadcast %cst_4 : f32 to vector<8x1xf32>
    %20 = arith.addf %18, %19 : vector<8x1xf32>
    %21 = math.rsqrt %20 : vector<8x1xf32>
    %22 = vector.broadcast %21 : vector<8x1xf32> to vector<8x128xf32>
    %23 = arith.mulf %13, %22 : vector<8x128xf32>
    %c0_5 = arith.constant 0 : index
    %c0_6 = arith.constant 0 : index
    %24 = vector.load %arg2[%c0_5, %c0_6] : memref<1x128xf32, #tpu.memory_space<vmem>>, vector<1x128xf32>
    %25 = vector.broadcast %24 : vector<1x128xf32> to vector<8x128xf32>
    %26 = arith.mulf %23, %25 : vector<8x128xf32>
    %27 = arith.truncf %26 : vector<8x128xf32> to vector<8x128xbf16>
    %c0_7 = arith.constant 0 : index
    %c0_8 = arith.constant 0 : index
    %28 = vector.load %arg3[%c0_7, %c0_8] : memref<128x128xbf16, #tpu.memory_space<vmem>>, vector<128x128xbf16>
    %cst_9 = arith.constant dense<0.000000e+00> : vector<8x128xf32>
    %29 = tpu.matmul %27, %28, %cst_9 {dimension_numbers = #tpu.dot_dimension_numbers<[1], [0], [0], [1], [0, 0, 1, 1], [], []>} : vector<8x128xbf16>, vector<128x128xbf16>, vector<8x128xf32> -> vector<8x128xf32>
    %c0_10 = arith.constant 0 : index
    %c0_11 = arith.constant 0 : index
    %30 = vector.load %arg4[%c0_10, %c0_11] : memref<1x128xf32, #tpu.memory_space<vmem>>, vector<1x128xf32>
    %31 = vector.broadcast %30 : vector<1x128xf32> to vector<8x128xf32>
    %32 = arith.addf %29, %31 : vector<8x128xf32>
    %c0_12 = arith.constant 0 : index
    %c0_13 = arith.constant 0 : index
    %33 = vector.load %arg1[%c0_12, %c0_13] : memref<8x128xf32, #tpu.memory_space<vmem>>, vector<8x128xf32>
    %34 = arith.addf %32, %33 : vector<8x128xf32>
    %c0_14 = arith.constant 0 : index
    %c0_15 = arith.constant 0 : index
    %35 = vector.load %arg5[%c0_14, %c0_15] : memref<8x128xf32, #tpu.memory_space<vmem>>, vector<8x128xf32>
    tpu.vector_store %arg5[%c0_14, %c0_15], %34 {strides = array<i32>} : memref<8x128xf32, #tpu.memory_space<vmem>>, vector<8x128xf32>,
    return
  }
  func.func @transform_0(%arg0: i32) -> (i32, i32) {
    %c0_i32 = arith.constant 0 : i32
    %c0_i32_0 = arith.constant 0 : i32
    return %arg0, %c0_i32 : i32, i32
  }
  func.func @transform_1(%arg0: i32) -> (i32, i32) {
    %c0_i32 = arith.constant 0 : i32
    %c0_i32_0 = arith.constant 0 : i32
    %c0_i32_1 = arith.constant 0 : i32
    return %c0_i32, %c0_i32_0 : i32, i32
  }
  func.func @transform_2(%arg0: i32) -> (i32, i32) {
    %c0_i32 = arith.constant 0 : i32
    %c0_i32_0 = arith.constant 0 : i32
    %c0_i32_1 = arith.constant 0 : i32
    return %c0_i32, %c0_i32_0 : i32, i32
  }
  func.func @transform_3(%arg0: i32) -> (i32, i32) {
    %c0_i32 = arith.constant 0 : i32
    %c0_i32_0 = arith.constant 0 : i32
    %c0_i32_1 = arith.constant 0 : i32
    return %c0_i32, %c0_i32_0 : i32, i32
  }
  func.func @transform_4(%arg0: i32) -> (i32, i32) {
    %c0_i32 = arith.constant 0 : i32
    %c0_i32_0 = arith.constant 0 : i32
    return %arg0, %c0_i32 : i32, i32
  }
}

</mosaic_0001>

<bundles_post_ra>
// kernel: skip_connection.1
= control target key start
LH: loop header
LB: loop body
LE: loop exit
PB: predicated region body
PF: predicated region fallthrough
CT: control target
= control target key end

     0   :  { %s459_s15 = smov 0   ;;  %s513_s0 = inlined_call_operand.vmem [shape: f32[16,128], index: 0, kind: input, shape index: {}]   ;;  %s514_s1 = inlined_call_operand.vmem [shape: f32[1,128], index: 1, kind: input, shape index: {}]   ;;  %s515_s2 = inlined_call_operand.vmem [shape: bf16[128,128], index: 2, kind: input, shape index: {}]   ;;  %s516_s3 = inlined_call_operand.vmem [shape: f32[1,128], index: 3, kind: input, shape index: {}]   ;;  %s517_s4 = inlined_call_operand.vmem [shape: f32[16,128], index: 4, kind: output, shape index: {}]  }
   0x1 LB: > { %s362_s16 = sadd.s32 4294967295, %s431_s15   ;;  %p366_p0 = scmp.ge.s32.totalorder %s431_s15, 1  ;;  %s431_s15 = sphi %s459_s15, %s14_s15  }
   0x2   : > { %p161_p1 = scmp.lt.s32.totalorder %s431_s15, 3 }
   0x4   : > { %p162_p2 = pnand %p366_p0, %p161_p1 }
   0x5   : > { %p185_p3 = scmp.lt.s32.totalorder (!%p162_p2), %s362_s16, 1 }
   0x6   : > { %165 = sbr.rel (%p162_p2) target bundleno = 417 (0x1a1), region = 36 }
   0xb   : > { %s519_s16 = smov (!%p185_p3, %s362_s16), 1  ;;  %v411_v1 = vld [vmem:[%s515_s2 + $0x38] sm:$0xff]  ;;  %v198_v2 = vlaneseq  ;;  %v433_v6 = vmov 0.0   ;;  %v410_v11 = vld [vmem:[%s515_s2 + $0x30] sm:$0xff]  ;;  %v409_v12 = vld [vmem:[%s515_s2 + $0x28] sm:$0xff] }
   0xc   : > { %s367_s17 = sshll.u32 %s519_s16, 3  ;;  %294 = vmatpush.bf16.msra.mxu0 %v411_v1  ;;  %v408_v13 = vld [vmem:[%s515_s2 + $0x20] sm:$0xff]  ;;  %v407_v14 = vld [vmem:[%s515_s2 + $0x18] sm:$0xff]  ;;  %v406_v15 = vld [vmem:[%s515_s2 + $0x10] sm:$0xff] }
   0xd   : > { %s188_s20 = scalar_lea.vmem %s513_s0, %s367_s17  ;;  %v199_v3 = vand.u32 127, %v198_v2  ;;  %v405_v16 = vld [vmem:[%s515_s2 + $0x8] sm:$0xff]  ;;  %v404_v17 = vld [vmem:[%s515_s2] sm:$0xff] }
   0xe   : > { %v193_v0 = vld [vmem:[%s188_s20] sm:$0xff]  ;;  %s192_s20 = scalar_lea.vmem %s517_s4, %s367_s17 }
   0xf   : > { %194 = vadd.xlane.f32.xlu0 %v193_v0  ;;  %vm200_vm0 = vcmp.lt.s32.totalorder %v199_v3, 32  ;;  %v421_v27 = vld [vmem:[%s514_s1] ss:$0 sm:$0xff] }
  0x10   : > { %v369_v7 = vsel %vm200_vm0, 1.0, %v433_v6  ;;  %295 = vmatpush.bf16.msra.mxu0 %v410_v11  ;;  %v422_v32 = vld [vmem:[%s516_s3] ss:$0 sm:$0xff] }
  0x14   : > { %296 = vmatpush.bf16.msra.mxu0 %v409_v12 }
  0x18   : > { %297 = vmatpush.bf16.msra.mxu0 %v408_v13 }
  0x1c   : > { %298 = vmatpush.bf16.msra.mxu0 %v407_v14 }
  0x20   : > { %299 = vmatpush.bf16.msra.mxu0 %v406_v15 }
  0x24   : > { %300 = vmatpush.bf16.msra.mxu0 %v405_v16 }
  0x28   : > { %301 = vmatpush.bf16.msra.mxu0 %v404_v17 }
  0x82   : > { %v195_v4 = vpop.xlane.xlu0 %194 }
  0x83   : > { %v196_v5 = vmul.f32 0.03125, %v195_v4 }
  0x85   : > { %v197_v8 = vsub.f32 %v193_v0, %v196_v5 }
  0x87   : > { %v203_v9 = vmul.f32 %v369_v7, %v197_v8 }
  0x89   : > { %v204_v10 = vmul.f32 %v203_v9, %v203_v9 }
  0x8b   : > { %205 = vadd.xlane.f32.xlu0 %v204_v10 }
  0xfe   : > { %v206_v18 = vpop.xlane.xlu0 %205 }
  0xff   : > { %v207_v19 = vmul.f32 0.03125, %v206_v18 }
 0x101   : > { %v208_v20 = vadd.f32 1e-05, %v207_v19 }
 0x103   : > { %423 = vrsqrt.f32 %v208_v20  ;;  %vm215_vm2 = vweird.f32 %v208_v20 }
 0x109   : > { %v424_v21 = vpop.eup %423 }
 0x10a   : > { %v210_v22 = vmul.f32 %v424_v21, %v208_v20  ;;  %vm216_vm1 = vweird.f32 %v424_v21 }
 0x10b   : > { %vm217_vm3 = vmor %vm215_vm2, %vm216_vm1 }
 0x10c   : > { %v211_v23 = vmul.f32 %v424_v21, %v210_v22 }
 0x10e   : > { %v212_v24 = vmul.f32 0.5, %v211_v23 }
 0x110   : > { %v213_v25 = vsub.f32 1.5, %v212_v24 }
 0x112   : > { %v214_v26 = vmul.f32 %v424_v21, %v213_v25 }
 0x114   : > { %v218_v28 = vsel %vm217_vm3, %v424_v21, %v214_v26 }
 0x115   : > { %v219_v29 = vmul.f32 %v218_v28, %v203_v9 }
 0x117   : > { %v224_v30 = vmul.f32 %v421_v27, %v219_v29 }
 0x119   : > { %v225_v31 = vpack.c.bf16 %v224_v30, %v224_v30 }
 0x11b   : > { %302 = vmatmul.bf16.vlgmr.msra.gmra.mxu0 %v225_v31 }
 0x198   : > { %v303_v33 = vpop.f32.mrf.mxu0 }
 0x199   : > { %v304_v34 = vadd.f32 %v422_v32, %v303_v33 }
 0x19b   : > { %v307_v35 = vadd.f32 %v304_v34, %v193_v0 }
 0x19d   : > { %308 = vst [vmem:[%s192_s20] sm:$0xff] %v307_v35 }
 0x1a0   : > { %v305_v36 = vpop.f32.mrf.mxu0 }
 0x1a1 PF: > { %s14_s15 = sadd.s32 1, %s431_s15  }
 0x1a2   : > { %p11_p4 = scmp.ge.s32.totalorder %s14_s15, 4  }
 0x1a4   :  { %13 = sbr.rel (!%p11_p4) target bundleno = 1 (0x1), region = 66 }

</bundles_post_ra>
